<compile_context>
chip_gen: v7x
topology: tpu7x:2x2x1
jax: 0.10.0
libtpu: 0.0.40
codegen_flags: <defaults>
</compile_context>

<pallas_src>
import jax
import jax.numpy as jnp
import numpy as np
from jax import lax
from jax.experimental import pallas as pl
from jax.experimental.pallas import tpu as pltpu

BN_EPS = 1e-5
_LANE = 128
_VMEM_LIMIT_BYTES = 48 * 1024 * 1024  # fits v7x's 64 MiB physical VMEM with headroom


def _round_up(x, m):
    return (x + m - 1) // m * m


def _stats_kernel(x_ref, w1_ref, stats_ref):
    """Accumulate per-feature sum and sum-of-squares of g = x @ W1 across batch tiles."""
    @pl.when(pl.program_id(0) == 0)
    def _():
        stats_ref[...] = jnp.zeros_like(stats_ref)

    # bf16 MXU operands, f32 accumulation.
    g = jnp.dot(x_ref[...].astype(jnp.bfloat16), w1_ref[...],
                preferred_element_type=jnp.float32)
    s = jnp.sum(g, axis=0, keepdims=True)
    ss = jnp.sum(g * g, axis=0, keepdims=True)
    stats_ref[...] += jnp.concatenate([s, ss], axis=0)


def _apply_kernel(x_ref, w1_ref, scale_ref, shift_ref, w2_ref, b2_ref, o_ref):
    """z = relu((x @ W1) * scale + shift) @ W2 + b2  (scale/shift fold BN + affine)."""
    g = jnp.dot(x_ref[...].astype(jnp.bfloat16), w1_ref[...],
                preferred_element_type=jnp.float32)
    h = jnp.maximum(g * scale_ref[...] + shift_ref[...], 0.0)  # f32 VPU math
    z = jnp.dot(h.astype(jnp.bfloat16), w2_ref[...],
                preferred_element_type=jnp.float32) + b2_ref[...]
    o_ref[...] = z.astype(o_ref.dtype)


def projection_head(x, w1, b1, gamma, beta, w2, b2, *, block_b=512):
    """x: (B, D) float32. Returns (B, D//4) float32 (PyTorch train-mode semantics)."""
    del b1  # Exactly cancelled by train-mode BatchNorm (shifts the mean it removes).

    B, D = x.shape
    H = w1.shape[1]
    O = w2.shape[1]
    Hp = _round_up(H, _LANE)
    Op = _round_up(O, _LANE)

    # Batch tiling: TB in the 256-1024 range for big batches; whole batch otherwise.
    if B <= block_b:
        TB, Bp = B, B
    else:
        TB = block_b                      # multiple of 8 (sublane aligned)
        Bp = _round_up(B, TB)
    n_tiles = Bp // TB

    # Zero-pad batch (zero rows contribute 0 to both stat sums -> stats stay exact
    # because we divide by the true B) and lane-pad feature dims with exact zeros.
    x_p = x if Bp == B else jnp.pad(x, ((0, Bp - B), (0, 0)))
    w1_p = jnp.pad(w1, ((0, 0), (0, Hp - H))).astype(jnp.bfloat16)
    w2_p = jnp.pad(w2, ((0, Hp - H), (0, Op - O))).astype(jnp.bfloat16)
    b2_p = jnp.pad(b2, (0, Op - O)).reshape(1, Op).astype(jnp.float32)
    gamma_p = jnp.pad(gamma, (0, Hp - H)).reshape(1, Hp).astype(jnp.float32)
    beta_p = jnp.pad(beta, (0, Hp - H)).reshape(1, Hp).astype(jnp.float32)

    # ---------- Pass 1: batch-wide BN statistics (reduction over batch tiles) ----------
    stats = pl.pallas_call(
        _stats_kernel,
        out_shape=jax.ShapeDtypeStruct((2, Hp), jnp.float32),
        grid=(n_tiles,),
        in_specs=[
            pl.BlockSpec((TB, D), lambda i: (i, 0)),   # x tile (pipelined)
            pl.BlockSpec((D, Hp), lambda i: (0, 0)),   # W1 resident (bf16)
        ],
        out_specs=pl.BlockSpec((2, Hp), lambda i: (0, 0)),  # resident accumulator
        compiler_params=pltpu.CompilerParams(
            dimension_semantics=("arbitrary",),
            vmem_limit_bytes=_VMEM_LIMIT_BYTES),
        cost_estimate=pl.CostEstimate(
            flops=2 * Bp * D * Hp + 3 * Bp * Hp,
            transcendentals=0,
            bytes_accessed=Bp * D * 4 + D * Hp * 2 + 2 * Hp * 4),
    )(x_p, w1_p)

    # Finalize stats (tiny (1, Hp) math) and fold BN into a single scale/shift.
    mean = stats[0:1, :] / B
    mean_sq = stats[1:2, :] / B
    var = jnp.maximum(mean_sq - mean * mean, 0.0)          # biased (train-mode) variance
    inv_std = lax.rsqrt(var + BN_EPS)
    scale = gamma_p * inv_std
    shift = beta_p - mean * scale

    # ---------- Pass 2: apply BN + ReLU + second Linear (independent batch tiles) ----------
    out_p = pl.pallas_call(
        _apply_kernel,
        out_shape=jax.ShapeDtypeStruct((Bp, Op), jnp.float32),
        grid=(n_tiles,),
        in_specs=[
            pl.BlockSpec((TB, D), lambda i: (i, 0)),   # x tile (pipelined)
            pl.BlockSpec((D, Hp), lambda i: (0, 0)),   # W1 resident (bf16)
            pl.BlockSpec((1, Hp), lambda i: (0, 0)),   # scale resident
            pl.BlockSpec((1, Hp), lambda i: (0, 0)),   # shift resident
            pl.BlockSpec((Hp, Op), lambda i: (0, 0)),  # W2 resident (bf16)
            pl.BlockSpec((1, Op), lambda i: (0, 0)),   # b2 resident
        ],
        out_specs=pl.BlockSpec((TB, Op), lambda i: (i, 0)),  # lane-dense store
        compiler_params=pltpu.CompilerParams(
            dimension_semantics=("parallel",),
            vmem_limit_bytes=_VMEM_LIMIT_BYTES),
        cost_estimate=pl.CostEstimate(
            flops=2 * Bp * D * Hp + 2 * Bp * Hp * Op + 4 * Bp * Hp,
            transcendentals=0,
            bytes_accessed=(Bp * D * 4 + D * Hp * 2 + Hp * Op * 2
                            + 2 * Hp * 4 + Op * 4 + Bp * Op * 4)),
    )(x_p, w1_p, scale, shift, w2_p, b2_p)

    return out_p[:B, :O]


def projection_head_ref(x, w1, b1, gamma, beta, w2, b2):
    """Pure-JAX f32 reference (mirrors the PyTorch train-mode forward)."""
    h = x @ w1 + b1
    mu = jnp.mean(h, axis=0, keepdims=True)
    var = jnp.mean((h - mu) ** 2, axis=0, keepdims=True)
    h = (h - mu) / jnp.sqrt(var + BN_EPS) * gamma + beta
    h = jnp.maximum(h, 0.0)
    return h @ w2 + b2


if __name__ == "__main__":
    # Small shapes consistent with the module: context_dim = 32.
    B = 8
    D = 32            # config.context_dim
    H = D // 2        # 16
    O = D // 4        # 8

    key = jax.random.PRNGKey(0)
    kx, k1, kb1, k2, kb2 = jax.random.split(key, 5)

    x = jax.random.normal(kx, (B, D), dtype=jnp.float32)

    # Deterministic parameter init (Kaiming-uniform-ish bounds, like nn.Linear).
    lim1 = 1.0 / np.sqrt(D)
    w1 = jax.random.uniform(k1, (D, H), jnp.float32, -lim1, lim1)
    b1 = jax.random.uniform(kb1, (H,), jnp.float32, -lim1, lim1)
    gamma = jnp.ones((H,), jnp.float32)   # BatchNorm1d default affine init
    beta = jnp.zeros((H,), jnp.float32)
    lim2 = 1.0 / np.sqrt(H)
    w2 = jax.random.uniform(k2, (H, O), jnp.float32, -lim2, lim2)
    b2 = jax.random.uniform(kb2, (O,), jnp.float32, -lim2, lim2)

    fn = jax.jit(projection_head)
    out = jax.block_until_ready(fn(x, w1, b1, gamma, beta, w2, b2))

    ref = projection_head_ref(x, w1, b1, gamma, beta, w2, b2)
    # bf16 MXU operands (f32 accumulation) => ~1e-2-level deviation vs f32 reference.
    np.testing.assert_allclose(np.asarray(out), np.asarray(ref), rtol=5e-2, atol=5e-2)
    assert out.shape == (B, O)
    print("KERNEL_OK")
</pallas_src>

<mosaic_0001>
module attributes {stable_mosaic.version = 11 : i64} {
  func.func @_stats_kernel(%arg0: i32, %arg1: memref<8x32xf32, #tpu.memory_space<vmem>>, %arg2: memref<32x128xbf16, #tpu.memory_space<vmem>>, %arg3: memref<2x128xf32, #tpu.memory_space<vmem>>) attributes {dimension_semantics = [#tpu.dimension_semantics<arbitrary>], iteration_bounds = array<i64: 1>, scalar_prefetch = 0 : i64, scratch_operands = 0 : i64, tpu.core_type = #tpu.core_type<tc>, window_params = [{transform_indices = @transform_0, window_bounds = array<i64: 8, 32>}, {pipeline_mode = #tpu.pipeline_mode<synchronous>, transform_indices = @transform_1, window_bounds = array<i64: 32, 128>}, {pipeline_mode = #tpu.pipeline_mode<synchronous>, transform_indices = @transform_2, window_bounds = array<i64: 2, 128>}]} {
    %c0_i32 = arith.constant 0 : i32
    %0 = arith.cmpi eq, %arg0, %c0_i32 : i32
    %1 = arith.extui %0 : i1 to i32
    %c0_i32_0 = arith.constant 0 : i32
    %2 = arith.cmpi ne, %1, %c0_i32_0 : i32
    scf.if %2 {
      %cst_10 = arith.constant 0.000000e+00 : f32
      %16 = vector.broadcast %cst_10 : f32 to vector<2x128xf32>
      %c0_11 = arith.constant 0 : index
      %c0_12 = arith.constant 0 : index
      %17 = vector.load %arg3[%c0_11, %c0_12] : memref<2x128xf32, #tpu.memory_space<vmem>>, vector<2x128xf32>
      tpu.vector_store %arg3[%c0_11, %c0_12], %16 {strides = array<i32>} : memref<2x128xf32, #tpu.memory_space<vmem>>, vector<2x128xf32>,
    } else {
    }
    %c0 = arith.constant 0 : index
    %c0_1 = arith.constant 0 : index
    %3 = vector.load %arg1[%c0, %c0_1] : memref<8x32xf32, #tpu.memory_space<vmem>>, vector<8x32xf32>
    %4 = arith.truncf %3 : vector<8x32xf32> to vector<8x32xbf16>
    %c0_2 = arith.constant 0 : index
    %c0_3 = arith.constant 0 : index
    %5 = vector.load %arg2[%c0_2, %c0_3] : memref<32x128xbf16, #tpu.memory_space<vmem>>, vector<32x128xbf16>
    %cst = arith.constant dense<0.000000e+00> : vector<8x128xf32>
    %6 = tpu.matmul %4, %5, %cst {dimension_numbers = #tpu.dot_dimension_numbers<[1], [0], [0], [1], [0, 0, 1, 1], [], []>} : vector<8x32xbf16>, vector<32x128xbf16>, vector<8x128xf32> -> vector<8x128xf32>
    %cst_4 = arith.constant dense<0.000000e+00> : vector<128xf32>
    %7 = vector.multi_reduction <add>, %6, %cst_4 [0] : vector<8x128xf32> to vector<128xf32>
    %8 = vector.shape_cast %7 : vector<128xf32> to vector<1x128xf32>
    %9 = arith.mulf %6, %6 : vector<8x128xf32>
    %cst_5 = arith.constant dense<0.000000e+00> : vector<128xf32>
    %10 = vector.multi_reduction <add>, %9, %cst_5 [0] : vector<8x128xf32> to vector<128xf32>
    %11 = vector.shape_cast %10 : vector<128xf32> to vector<1x128xf32>
    %c0_6 = arith.constant 0 : index
    %c0_7 = arith.constant 0 : index
    %12 = vector.load %arg3[%c0_6, %c0_7] : memref<2x128xf32, #tpu.memory_space<vmem>>, vector<2x128xf32>
    %13 = tpu.concatenate %8, %11 in 0 : vector<1x128xf32>, vector<1x128xf32> -> vector<2x128xf32>
    %14 = arith.addf %12, %13 : vector<2x128xf32>
    %c0_8 = arith.constant 0 : index
    %c0_9 = arith.constant 0 : index
    %15 = vector.load %arg3[%c0_8, %c0_9] : memref<2x128xf32, #tpu.memory_space<vmem>>, vector<2x128xf32>
    tpu.vector_store %arg3[%c0_8, %c0_9], %14 {strides = array<i32>} : memref<2x128xf32, #tpu.memory_space<vmem>>, vector<2x128xf32>,
    return
  }
  func.func @transform_0(%arg0: i32) -> (i32, i32) {
    %c0_i32 = arith.constant 0 : i32
    %c0_i32_0 = arith.constant 0 : i32
    return %arg0, %c0_i32 : i32, i32
  }
  func.func @transform_1(%arg0: i32) -> (i32, i32) {
    %c0_i32 = arith.constant 0 : i32
    %c0_i32_0 = arith.constant 0 : i32
    %c0_i32_1 = arith.constant 0 : i32
    return %c0_i32, %c0_i32_0 : i32, i32
  }
  func.func @transform_2(%arg0: i32) -> (i32, i32) {
    %c0_i32 = arith.constant 0 : i32
    %c0_i32_0 = arith.constant 0 : i32
    %c0_i32_1 = arith.constant 0 : i32
    return %c0_i32, %c0_i32_0 : i32, i32
  }
}

module attributes {stable_mosaic.version = 11 : i64} {
  func.func @_apply_kernel(%arg0: i32, %arg1: memref<8x32xf32, #tpu.memory_space<vmem>>, %arg2: memref<32x128xbf16, #tpu.memory_space<vmem>>, %arg3: memref<1x128xf32, #tpu.memory_space<vmem>>, %arg4: memref<1x128xf32, #tpu.memory_space<vmem>>, %arg5: memref<128x128xbf16, #tpu.memory_space<vmem>>, %arg6: memref<1x128xf32, #tpu.memory_space<vmem>>, %arg7: memref<8x128xf32, #tpu.memory_space<vmem>>) attributes {dimension_semantics = [#tpu.dimension_semantics<parallel>], iteration_bounds = array<i64: 1>, scalar_prefetch = 0 : i64, scratch_operands = 0 : i64, tpu.core_type = #tpu.core_type<tc>, window_params = [{transform_indices = @transform_0, window_bounds = array<i64: 8, 32>}, {pipeline_mode = #tpu.pipeline_mode<synchronous>, transform_indices = @transform_1, window_bounds = array<i64: 32, 128>}, {pipeline_mode = #tpu.pipeline_mode<synchronous>, transform_indices = @transform_2, window_bounds = array<i64: 1, 128>}, {pipeline_mode = #tpu.pipeline_mode<synchronous>, transform_indices = @transform_3, window_bounds = array<i64: 1, 128>}, {pipeline_mode = #tpu.pipeline_mode<synchronous>, transform_indices = @transform_4, window_bounds = array<i64: 128, 128>}, {pipeline_mode = #tpu.pipeline_mode<synchronous>, transform_indices = @transform_5, window_bounds = array<i64: 1, 128>}, {transform_indices = @transform_6, window_bounds = array<i64: 8, 128>}]} {
    %c0 = arith.constant 0 : index
    %c0_0 = arith.constant 0 : index
    %0 = vector.load %arg1[%c0, %c0_0] : memref<8x32xf32, #tpu.memory_space<vmem>>, vector<8x32xf32>
    %1 = arith.truncf %0 : vector<8x32xf32> to vector<8x32xbf16>
    %c0_1 = arith.constant 0 : index
    %c0_2 = arith.constant 0 : index
    %2 = vector.load %arg2[%c0_1, %c0_2] : memref<32x128xbf16, #tpu.memory_space<vmem>>, vector<32x128xbf16>
    %cst = arith.constant dense<0.000000e+00> : vector<8x128xf32>
    %3 = tpu.matmul %1, %2, %cst {dimension_numbers = #tpu.dot_dimension_numbers<[1], [0], [0], [1], [0, 0, 1, 1], [], []>} : vector<8x32xbf16>, vector<32x128xbf16>, vector<8x128xf32> -> vector<8x128xf32>
    %c0_3 = arith.constant 0 : index
    %c0_4 = arith.constant 0 : index
    %4 = vector.load %arg3[%c0_3, %c0_4] : memref<1x128xf32, #tpu.memory_space<vmem>>, vector<1x128xf32>
    %5 = vector.broadcast %4 : vector<1x128xf32> to vector<8x128xf32>
    %6 = arith.mulf %3, %5 : vector<8x128xf32>
    %c0_5 = arith.constant 0 : index
    %c0_6 = arith.constant 0 : index
    %7 = vector.load %arg4[%c0_5, %c0_6] : memref<1x128xf32, #tpu.memory_space<vmem>>, vector<1x128xf32>
    %8 = vector.broadcast %7 : vector<1x128xf32> to vector<8x128xf32>
    %9 = arith.addf %6, %8 : vector<8x128xf32>
    %cst_7 = arith.constant 0.000000e+00 : f32
    %10 = vector.broadcast %cst_7 : f32 to vector<8x128xf32>
    %11 = arith.maximumf %9, %10 : vector<8x128xf32>
    %12 = arith.truncf %11 : vector<8x128xf32> to vector<8x128xbf16>
    %c0_8 = arith.constant 0 : index
    %c0_9 = arith.constant 0 : index
    %13 = vector.load %arg5[%c0_8, %c0_9] : memref<128x128xbf16, #tpu.memory_space<vmem>>, vector<128x128xbf16>
    %cst_10 = arith.constant dense<0.000000e+00> : vector<8x128xf32>
    %14 = tpu.matmul %12, %13, %cst_10 {dimension_numbers = #tpu.dot_dimension_numbers<[1], [0], [0], [1], [0, 0, 1, 1], [], []>} : vector<8x128xbf16>, vector<128x128xbf16>, vector<8x128xf32> -> vector<8x128xf32>
    %c0_11 = arith.constant 0 : index
    %c0_12 = arith.constant 0 : index
    %15 = vector.load %arg6[%c0_11, %c0_12] : memref<1x128xf32, #tpu.memory_space<vmem>>, vector<1x128xf32>
    %16 = vector.broadcast %15 : vector<1x128xf32> to vector<8x128xf32>
    %17 = arith.addf %14, %16 : vector<8x128xf32>
    %c0_13 = arith.constant 0 : index
    %c0_14 = arith.constant 0 : index
    %18 = vector.load %arg7[%c0_13, %c0_14] : memref<8x128xf32, #tpu.memory_space<vmem>>, vector<8x128xf32>
    tpu.vector_store %arg7[%c0_13, %c0_14], %17 {strides = array<i32>} : memref<8x128xf32, #tpu.memory_space<vmem>>, vector<8x128xf32>,
    return
  }
  func.func @transform_0(%arg0: i32) -> (i32, i32) {
    %c0_i32 = arith.constant 0 : i32
    %c0_i32_0 = arith.constant 0 : i32
    return %arg0, %c0_i32 : i32, i32
  }
  func.func @transform_1(%arg0: i32) -> (i32, i32) {
    %c0_i32 = arith.constant 0 : i32
    %c0_i32_0 = arith.constant 0 : i32
    %c0_i32_1 = arith.constant 0 : i32
    return %c0_i32, %c0_i32_0 : i32, i32
  }
  func.func @transform_2(%arg0: i32) -> (i32, i32) {
    %c0_i32 = arith.constant 0 : i32
    %c0_i32_0 = arith.constant 0 : i32
    %c0_i32_1 = arith.constant 0 : i32
    return %c0_i32, %c0_i32_0 : i32, i32
  }
  func.func @transform_3(%arg0: i32) -> (i32, i32) {
    %c0_i32 = arith.constant 0 : i32
    %c0_i32_0 = arith.constant 0 : i32
    %c0_i32_1 = arith.constant 0 : i32
    return %c0_i32, %c0_i32_0 : i32, i32
  }
  func.func @transform_4(%arg0: i32) -> (i32, i32) {
    %c0_i32 = arith.constant 0 : i32
    %c0_i32_0 = arith.constant 0 : i32
    %c0_i32_1 = arith.constant 0 : i32
    return %c0_i32, %c0_i32_0 : i32, i32
  }
  func.func @transform_5(%arg0: i32) -> (i32, i32) {
    %c0_i32 = arith.constant 0 : i32
    %c0_i32_0 = arith.constant 0 : i32
    %c0_i32_1 = arith.constant 0 : i32
    return %c0_i32, %c0_i32_0 : i32, i32
  }
  func.func @transform_6(%arg0: i32) -> (i32, i32) {
    %c0_i32 = arith.constant 0 : i32
    %c0_i32_0 = arith.constant 0 : i32
    return %arg0, %c0_i32 : i32, i32
  }
}

</mosaic_0001>

<bundles_post_ra>
// kernel: projection_head.2
= control target key start
LH: loop header
LB: loop body
LE: loop exit
PB: predicated region body
PF: predicated region fallthrough
CT: control target
= control target key end

     0   :  { %v119_v0 = vmov 0.0   ;;  %vm120_vm0 = vmmov 0   ;;  %vm35_vm1 = vcmask 261120   ;;  %vm93_vm2 = vcmask 1040384   ;;  %s154_s2 = inlined_call_operand.vmem [shape: f32[2,128], index: 2, kind: output, shape index: {}]   ;;  %s155_s1 = inlined_call_operand.vmem [shape: bf16[32,128], index: 1, kind: input, shape index: {}]   ;;  %s156_s0 = inlined_call_operand.vmem [shape: f32[8,32], index: 0, kind: input, shape index: {}]  }
   0x1   :  { %16 = vst [vmem:[%s154_s2] sm:$0x3] %v119_v0  ;;  %107 = vmatprep.subr.bf16.mxu0 %v119_v0  ;;  %v117_v1 = vld [vmem:[%s155_s1] sm:$0xff]   ;;  %111 = vmatprep.mubr.msk.bf16.mxu0 %vm120_vm0, %v119_v0  ;;  %v118_v2 = vld [vmem:[%s155_s1 + $0x8] sm:$0xff]  }
   0x2   :  { %108 = vmatpush3.bf16.msra.mxu0 %v117_v1  ;;  %v17_v3 = vld [vmem:[%s156_s0] sm:$0xff] }
   0x3   :  { %109 = vmatprep.subr.bf16.mxu0 %v119_v0  ;;  %v18_v4 = vpack.c.bf16 %v17_v3, %v17_v3 }
   0x6   :  { %110 = vmatpush3.bf16.msra.mxu0 %v118_v2 }
   0x8   :  { %v92_v20 = vld [vmem:[%s154_s2] sm:$0x3] }
   0x9   :  { %112 = vmatmul.mubr.msk.bf16.vlgmr.msra.gmra.mrb[0].mxu0 %vm35_vm1, %v18_v4 }
  0xdc   :  { %v73_v5 = vpop.f32.mrb[0].mxu0 }
  0xdd   :  { %v79_v6 = vrot.slane %v73_v5, 4  ;;  %v85_v7 = vmul.f32 %v73_v5, %v73_v5  ;;  %v113_v8 = vpop.f32.mrb[1].mxu0 }
  0xde   :  { %v76_v9 = vpop.f32.mrb[2].mxu0 }
  0xdf   :  { %v80_v10 = vadd.f32 %v79_v6, %v73_v5  ;;  %v86_v11 = vrot.slane %v85_v7, 4  ;;  %v114_v12 = vpop.f32.mrb[3].mxu0 }
  0xe1   :  { %v81_v13 = vrot.slane %v80_v10, 2  ;;  %v87_v14 = vadd.f32 %v86_v11, %v85_v7 }
  0xe3   :  { %v82_v15 = vadd.f32 %v81_v13, %v80_v10  ;;  %v88_v16 = vrot.slane %v87_v14, 2 }
  0xe5   :  { %v83_v17 = vrot.slane %v82_v15, 1  ;;  %v89_v18 = vadd.f32 %v88_v16, %v87_v14 }
  0xe7   :  { %v90_v19 = vrot.slane %v89_v18, 1  ;;  %v84_v21 = vadd.f32 %v83_v17, %v82_v15 }
  0xe9   :  { %v91_v22 = vadd.f32 %v90_v19, %v89_v18 }
  0xeb   :  { %v94_v23 = vsel %vm93_vm2, %v84_v21, %v91_v22 }
  0xec   :  { %v95_v24 = vadd.f32 %v94_v23, %v92_v20 }
  0xee   :  { %96 = vst [vmem:[%s154_s2] sm:$0x3] %v95_v24 }

// kernel: projection_head.3
= control target key start
LH: loop header
LB: loop body
LE: loop exit
PB: predicated region body
PF: predicated region fallthrough
CT: control target
= control target key end

     0   :  { %v322_v1 = vmov 0.0   ;;  %vm323_vm0 = vmmov 0   ;;  %vm43_vm1 = vcmask 261120   ;;  %s414_s0 = inlined_call_operand.vmem [shape: f32[8,32], index: 0, kind: input, shape index: {}]   ;;  %s415_s1 = inlined_call_operand.vmem [shape: bf16[32,128], index: 1, kind: input, shape index: {}]   ;;  %s416_s2 = inlined_call_operand.vmem [shape: f32[1,128], index: 2, kind: input, shape index: {}]   ;;  %s417_s3 = inlined_call_operand.vmem [shape: f32[1,128], index: 3, kind: input, shape index: {}]   ;;  %s418_s4 = inlined_call_operand.vmem [shape: bf16[128,128], index: 4, kind: input, shape index: {}]   ;;  %s419_s5 = inlined_call_operand.vmem [shape: f32[1,128], index: 5, kind: input, shape index: {}]   ;;  %s420_s6 = inlined_call_operand.hbm [shape: f32[8,128], index: 6, kind: output, shape index: {}]  }
   0x1   :  { %v288_v0 = vld [vmem:[%s415_s1] sm:$0xff]   ;;  %257 = vmatprep.subr.bf16.mxu0 %v322_v1  ;;  %v289_v2 = vld [vmem:[%s415_s1 + $0x8] sm:$0xff]   ;;  %265 = vmatprep.subr.bf16.mxu1 %v322_v1  ;;  %v292_v7 = vld [vmem:[%s418_s4 + $0x10] sm:$0xff]  }
   0x2   :  { %258 = vmatpush3.bf16.msra.mxu0 %v288_v0  ;;  %261 = vmatprep.mubr.msk.bf16.mxu0 %vm323_vm0, %v322_v1  ;;  %v25_v3 = vld [vmem:[%s414_s0] sm:$0xff]  ;;  %v291_v6 = vld [vmem:[%s418_s4 + $0x8] sm:$0xff]  }
   0x3   :  { %259 = vmatprep.subr.bf16.mxu0 %v322_v1  ;;  %v290_v4 = vld [vmem:[%s418_s4] sm:$0xff]   ;;  %281 = vmatprep.mubr.msk.bf16.mxu1 %vm323_vm0, %v322_v1  ;;  %v26_v5 = vpack.c.bf16 %v25_v3, %v25_v3 }
   0x4   :  { %266 = vmatpush3.bf16.msra.mxu1 %v290_v4 }
   0x5   :  { %267 = vmatprep.subr.bf16.mxu1 %v322_v1 }
   0x6   :  { %260 = vmatpush3.bf16.msra.mxu0 %v289_v2 }
   0x8   :  { %268 = vmatpush3.bf16.msra.mxu1 %v291_v6 }
   0x9   :  { %262 = vmatmul.mubr.msk.bf16.vlgmr.msra.gmra.mrb[0].mxu0 %vm43_vm1, %v26_v5 }
   0xa   :  { %11 = vsyncpa [#allocation3], 0  ;;  %269 = vmatprep.subr.bf16.mxu1 %v322_v1  ;;  %v293_v8 = vld [vmem:[%s418_s4 + $0x18] sm:$0xff]   ;;  %v294_v9 = vld [vmem:[%s418_s4 + $0x20] sm:$0xff]   ;;  %s324_s22 = smov [#allocation2]  }
   0xb   :  { %v295_v10 = vld [vmem:[%s418_s4 + $0x28] sm:$0xff]   ;;  %v296_v11 = vld [vmem:[%s418_s4 + $0x30] sm:$0xff]   ;;  %v297_v12 = vld [vmem:[%s418_s4 + $0x38] sm:$0xff]   ;;  %s223_s23 = sshll.u32 %s324_s22, 4  ;;  %s224_s23 = int_to_ptr.vmem [resolvable:$true] %s223_s23 }
   0xc   :  { %270 = vmatpush3.bf16.msra.mxu1 %v292_v7  ;;  %v234_v13 = vld [vmem:[%s416_s2] ss:$0 sm:$0xff]  ;;  %s298_s2 = scalar_lea.vmem %s224_s23, 128  ;;  %p303_p1 = scmp.lt.s32.totalorder %s224_s23, %s224_s23 }
   0xd   :  { %271 = vmatprep.subr.bf16.mxu1 %v322_v1  ;;  %v235_v15 = vld [vmem:[%s417_s3] ss:$0 sm:$0xff]  ;;  %p299_p0 = scmp.ne.s32.totalorder %s224_s23, %s298_s2  ;;  %p304_p2 = scmp.lt.s32.totalorder %s298_s2, %s298_s2 }
   0xe   :  { %v236_v23 = vld [vmem:[%s419_s5] ss:$0 sm:$0xff] }
   0xf   :  { %p305_p3 = por %p304_p2, %p303_p1 }
  0x10   :  { %272 = vmatpush3.bf16.msra.mxu1 %v293_v8 }
  0x11   :  { %273 = vmatprep.subr.bf16.mxu1 %v322_v1  ;;  %p306_p4 = pnand %p305_p3, %p299_p0 }
  0x14   :  { %274 = vmatpush3.bf16.msra.mxu1 %v294_v9 }
  0x15   :  { %275 = vmatprep.subr.bf16.mxu1 %v322_v1 }
  0x18   :  { %276 = vmatpush3.bf16.msra.mxu1 %v295_v10 }
  0x19   :  { %277 = vmatprep.subr.bf16.mxu1 %v322_v1 }
  0x1c   :  { %278 = vmatpush3.bf16.msra.mxu1 %v296_v11 }
  0x1d   :  { %279 = vmatprep.subr.bf16.mxu1 %v322_v1 }
  0x20   :  { %280 = vmatpush3.bf16.msra.mxu1 %v297_v12 }
  0xdc   :  { %v81_v14 = vpop.f32.mrb[0].mxu0 }
  0xdd   :  { %v94_v16 = vmul.f32 %v234_v13, %v81_v14  ;;  %v263_v17 = vpop.f32.mrb[1].mxu0 }
  0xde   :  { %v84_v18 = vpop.f32.mrb[2].mxu0 }
  0xdf   :  { %v102_v19 = vadd.f32 %v235_v15, %v94_v16  ;;  %v264_v20 = vpop.f32.mrb[3].mxu0 }
  0xe1   :  { %v103_v21 = vmax.f32 %v102_v19, 0.0 }
  0xe3   :  { %v104_v22 = vpack.c.bf16 %v103_v21, %v103_v21 }
  0xe5   :  { %282 = vmatmul.mubr.bf16.vlgmr.msra.gmra.mrb[0].mxu1 %v104_v22 }
 0x1b8   :  { %v210_v24 = vpop.f32.mrb[0].mxu1 }
 0x1b9   :  { %v211_v25 = vadd.f32 %v236_v23, %v210_v24  ;;  %v283_v26 = vpop.f32.mrb[1].mxu1 }
 0x1ba   :  { %v213_v27 = vpop.f32.mrb[2].mxu1 }
 0x1bb   :  { %216 = vst [vmem:[#allocation2] sm:$0xff] %v211_v25  ;;  %v284_v28 = vpop.f32.mrb[3].mxu1 }
 0x1bc   :  { %309 = shalt.err (!%p306_p4)
}
 0x1bd   :  { %s310_s5 = scalar_lea.hbm %s420_s6, 128 }
 0x1be   :  { %p311_p5 = scmp.ne.s32.totalorder %s420_s6, %s310_s5  ;;  %p314_p6 = scmp.lt.u32.totalorder %s310_s5, %s420_s6 }
 0x1c0   :  { %p316_p7 = pnand %p314_p6, %p311_p5 }
 0x1c2   :  { %319 = shalt.err (!%p316_p7)
}
 0x1c3   :  { %226 = dma.vmem_to_hbm [thread:$0]  %s224_s23, 128, %s420_s6, [#allocation3]  }
 0x1c4   :  { %320 = dma.done.wait [#allocation3], 128  }
 0x1c5   :  { %321 = vsyncadd [#allocation3], 4294967168 }
 0x1c6   :  { %230 = vsyncpa [#allocation3], 1 }

</bundles_post_ra>
